<compile_context>
chip_gen: v6e
topology: v6e:2x2x1
jax: 0.10.0
libtpu: 0.0.40
codegen_flags: <defaults>
</compile_context>

<pallas_src>
import math

import jax
import jax.numpy as jnp
import numpy as np
from jax.experimental import pallas as pl
from jax.experimental.pallas import tpu as pltpu


# ----------------------------------- kernel -----------------------------------

def _pe_kernel(inv_freq_ref, phase_ref, o_ref):
    """Writes one (1, row_tile, d_model) tile of the sinusoidal PE table.

    PE[pos, c] = sin(pos * inv_freq[c] + phase[c])
      inv_freq[c] = exp((c // 2) * 2 * -ln(10000)/d_model)
      phase[c]    = 0 if c even else pi/2   (so odd channels produce cos)
    Exactly one EUP transcendental per element; everything channel-dependent comes
    in via tiny VMEM-resident (1, d_model) inputs with a constant index_map.
    """
    _, rows, d_model = o_ref.shape
    row0 = pl.program_id(0) * rows                       # absolute position of tile row 0
    pos = (row0 + jax.lax.broadcasted_iota(jnp.int32, (rows, d_model), 0)
           ).astype(jnp.float32)                         # (rows, d_model)
    angle = pos * inv_freq_ref[...] + phase_ref[...]     # (rows,d) * (1,d) + (1,d)
    o_ref[0] = jnp.sin(angle).astype(o_ref.dtype)


# ---------------------------------- wrapper ------------------------------------

def _freq_and_phase(d_model):
    # Mirrors torch: div_term = exp(arange(0, d_model, 2) * -(ln(10000)/d_model)).
    # Channel c uses frequency index c // 2; odd channels get a +pi/2 phase so that
    # sin(angle + pi/2) == cos(angle).  Computed host-side in f32 (tiny arrays).
    exponent = (np.arange(0, d_model, 2, dtype=np.float32)
                * np.float32(-(math.log(10000.0) / d_model)))
    div_term = np.exp(exponent).astype(np.float32)
    inv_freq = np.repeat(div_term, 2).reshape(1, d_model)
    phase = np.tile(np.array([0.0, np.pi / 2.0], dtype=np.float32),
                    d_model // 2).reshape(1, d_model)
    return inv_freq, phase


def positional_encoding(length, d_model=512, max_len=10000, *,
                        row_tile=1024, dtype=jnp.float32):
    """Pallas equivalent of PositionalEncoding(d_model, max_len).forward(length).

    Returns an array of shape (1, length, d_model) in `dtype` (default float32,
    matching the PyTorch buffer).  `length` must be a static Python int.
    """
    assert d_model % 2 == 0, "d_model must be even (matches the PyTorch module)"
    length = int(length)
    assert 0 < length <= max_len

    # Row tile: clamp to the sequence length, keep the full d_model on the lane
    # axis (unmasked stores when d_model % 128 == 0).  Sublane packing is 8 rows
    # for 4-byte dtypes and 16 rows for 2-byte dtypes (bf16).
    sub = 8 if jnp.dtype(dtype).itemsize >= 4 else 16
    rounded_len = ((length + sub - 1) // sub) * sub
    tile = max(sub, min(int(row_tile), rounded_len))
    tile = ((tile + sub - 1) // sub) * sub
    grid = (pl.cdiv(length, tile),)                       # partial edge block is masked

    inv_freq, phase = _freq_and_phase(d_model)            # tiny, VMEM-resident

    # TODO(synk): for positions approaching max_len=10000, f32 sin range reduction
    # can drift past ~1e-4 vs the torch/NumPy f32 reference; use extended-precision
    # range reduction if exact parity at very large positions is required.
    return pl.pallas_call(
        _pe_kernel,
        out_shape=jax.ShapeDtypeStruct((1, length, d_model), dtype),
        grid=grid,
        in_specs=[pl.BlockSpec((1, d_model), lambda i: (0, 0)),
                  pl.BlockSpec((1, d_model), lambda i: (0, 0))],
        out_specs=pl.BlockSpec((1, tile, d_model), lambda i: (0, i, 0)),
        compiler_params=pltpu.CompilerParams(dimension_semantics=("parallel",)),
    )(jnp.asarray(inv_freq), jnp.asarray(phase))


class PositionalEncoding:
    """Module-style wrapper: caches generated tables so repeated forward() calls
    with the same length are free (mirrors the PyTorch registered buffer)."""

    def __init__(self, d_model: int = 512, max_len: int = 10000,
                 dtype=jnp.float32, row_tile: int = 1024):
        self.d_model, self.max_len, self.dtype, self.row_tile = d_model, max_len, dtype, row_tile
        self._cache = {}

    def __call__(self, length: int):
        length = int(length)
        if length not in self._cache:
            self._cache[length] = positional_encoding(
                length, self.d_model, self.max_len,
                row_tile=self.row_tile, dtype=self.dtype)
        return self._cache[length]


# ------------------------------ pure-NumPy reference ----------------------------

def reference_pe(length, d_model, max_len=10000):
    """Direct NumPy mirror of the PyTorch module (float32 throughout)."""
    pe = np.zeros((max_len, d_model), dtype=np.float32)
    position = np.arange(0, max_len, dtype=np.float32)[:, None]
    exponent = (np.arange(0, d_model, 2, dtype=np.float32)
                * np.float32(-(math.log(10000.0) / d_model)))
    div_term = np.exp(exponent).astype(np.float32)
    pe[:, 0::2] = np.sin(position * div_term)
    pe[:, 1::2] = np.cos(position * div_term)
    return pe[None, :length]


# ------------------------------------ main --------------------------------------

if __name__ == "__main__":
    # forward() takes only `length` (no tensor inputs); key created for harness
    # determinism but unused.
    _ = jax.random.PRNGKey(0)

    # Case 1: small, lane-dense d_model; single (length-clamped) tile.
    length, d_model = 40, 128
    out = jax.block_until_ready(positional_encoding(length, d_model))
    assert out.shape == (1, length, d_model)
    np.testing.assert_allclose(np.asarray(out), reference_pe(length, d_model),
                               atol=2e-4, rtol=2e-4)

    # Case 2: module-default d_model=512, multi-step parallel grid with a masked
    # partial edge block (300 rows, tile 128 -> 3 grid steps, last one partial).
    length2, d_model2 = 300, 512
    pe_module = PositionalEncoding(d_model=d_model2, row_tile=128)
    out2 = jax.block_until_ready(pe_module(length2))
    assert out2.shape == (1, length2, d_model2)
    np.testing.assert_allclose(np.asarray(out2), reference_pe(length2, d_model2),
                               atol=2e-3, rtol=2e-3)

    print("KERNEL_OK")
</pallas_src>

<mosaic_0001>
module attributes {stable_mosaic.version = 11 : i64} {
  func.func @_pe_kernel(%arg0: i32, %arg1: memref<1x128xf32, #tpu.memory_space<vmem>>, %arg2: memref<1x128xf32, #tpu.memory_space<vmem>>, %arg3: memref<1x40x128xf32, #tpu.memory_space<vmem>>) attributes {dimension_semantics = [#tpu.dimension_semantics<parallel>], iteration_bounds = array<i64: 1>, scalar_prefetch = 0 : i64, scratch_operands = 0 : i64, tpu.core_type = #tpu.core_type<tc>, window_params = [{pipeline_mode = #tpu.pipeline_mode<synchronous>, transform_indices = @transform_0, window_bounds = array<i64: 1, 128>}, {pipeline_mode = #tpu.pipeline_mode<synchronous>, transform_indices = @transform_1, window_bounds = array<i64: 1, 128>}, {transform_indices = @transform_2, window_bounds = array<i64: 1, 40, 128>}]} {
    %c40_i32 = arith.constant 40 : i32
    %0 = arith.muli %arg0, %c40_i32 : i32
    %1 = tpu.iota {dimensions = array<i32: 0>} : vector<40x128xi32>
    %2 = vector.broadcast %0 : i32 to vector<40x128xi32>
    %3 = arith.addi %2, %1 : vector<40x128xi32>
    %4 = arith.sitofp %3 : vector<40x128xi32> to vector<40x128xf32>
    %c0 = arith.constant 0 : index
    %c0_0 = arith.constant 0 : index
    %5 = vector.load %arg1[%c0, %c0_0] : memref<1x128xf32, #tpu.memory_space<vmem>>, vector<1x128xf32>
    %6 = vector.broadcast %5 : vector<1x128xf32> to vector<40x128xf32>
    %7 = arith.mulf %4, %6 : vector<40x128xf32>
    %c0_1 = arith.constant 0 : index
    %c0_2 = arith.constant 0 : index
    %8 = vector.load %arg2[%c0_1, %c0_2] : memref<1x128xf32, #tpu.memory_space<vmem>>, vector<1x128xf32>
    %9 = vector.broadcast %8 : vector<1x128xf32> to vector<40x128xf32>
    %10 = arith.addf %7, %9 : vector<40x128xf32>
    %11 = math.sin %10 : vector<40x128xf32>
    %c0_3 = arith.constant 0 : index
    %c0_4 = arith.constant 0 : index
    %c0_5 = arith.constant 0 : index
    %12 = vector.load %arg3[%c0_3, %c0_4, %c0_5] : memref<1x40x128xf32, #tpu.memory_space<vmem>>, vector<1x40x128xf32>
    %13 = vector.shape_cast %12 : vector<1x40x128xf32> to vector<40x128xf32>
    %14 = vector.shape_cast %11 : vector<40x128xf32> to vector<1x40x128xf32>
    tpu.vector_store %arg3[%c0_3, %c0_4, %c0_5], %14 {strides = array<i32>} : memref<1x40x128xf32, #tpu.memory_space<vmem>>, vector<1x40x128xf32>,
    return
  }
  func.func @transform_0(%arg0: i32) -> (i32, i32) {
    %c0_i32 = arith.constant 0 : i32
    %c0_i32_0 = arith.constant 0 : i32
    %c0_i32_1 = arith.constant 0 : i32
    return %c0_i32, %c0_i32_0 : i32, i32
  }
  func.func @transform_1(%arg0: i32) -> (i32, i32) {
    %c0_i32 = arith.constant 0 : i32
    %c0_i32_0 = arith.constant 0 : i32
    %c0_i32_1 = arith.constant 0 : i32
    return %c0_i32, %c0_i32_0 : i32, i32
  }
  func.func @transform_2(%arg0: i32) -> (i32, i32, i32) {
    %c0_i32 = arith.constant 0 : i32
    %c0_i32_0 = arith.constant 0 : i32
    %c0_i32_1 = arith.constant 0 : i32
    return %c0_i32, %arg0, %c0_i32_0 : i32, i32, i32
  }
}

</mosaic_0001>

<bundles_post_ra>
// kernel: tpu_custom_call.1
= control target key start
LH: loop header
LB: loop body
LE: loop exit
PB: predicated region body
PF: predicated region fallthrough
CT: control target
= control target key end

     0   :  { %7 = vsyncpa [#allocation3], 0  ;;  %s1131_s0 = inlined_call_operand.hbm [shape: f32[1,128], index: 0, kind: input, shape index: {}]   ;;  %s1132_s1 = inlined_call_operand.vmem [shape: f32[1,128], index: 1, kind: input, shape index: {}]   ;;  %s1133_s2 = inlined_call_operand.hbm [shape: f32[1,40,128], index: 2, kind: output, shape index: {}]  }
   0x1   :  { %8 = vsyncpa [#allocation4], 0  ;;  %s724_s9 = smov [#allocation2]  }
   0x2   :  { %s15_s10 = sshll.u32 %s724_s9, 4  ;;  %s16_s10 = int_to_ptr.vmem [resolvable:$true] %s15_s10 }
   0x3   :  { %s688_s11 = scalar_lea.vmem %s16_s10, 16  ;;  %s692_s12 = scalar_lea.vmem %s16_s10, 32 }
   0x4   :  { %p689_p0 = scmp.ne.s32.totalorder %s16_s10, %s688_s11  ;;  %p693_p1 = scmp.lt.s32.totalorder %s16_s10, %s16_s10 }
   0x5   :  { %p694_p2 = scmp.lt.s32.totalorder %s692_s12, %s688_s11 }
   0x7   :  { %p695_p3 = por %p694_p2, %p693_p1 }
   0x9   :  { %p696_p4 = pnand %p695_p3, %p689_p0 }
   0xb   :  { %699 = shalt.err (!%p696_p4)
}
   0xc   :  { %18 = dma.hbm_to_vmem [thread:$0]  %s1131_s0, 16, %s16_s10, [#allocation3]  }
   0xd   :  { %720 = dma.done.wait [#allocation3], 16  }
   0xe   :  { %721 = vsyncadd [#allocation3], 4294967280  ;;  %v25_v0 = vlaneseq  ;;  %v608_v9 = vld [vmem:[#allocation2] ss:$0 sm:$0xff]  ;;  %v725_v50 = vmov 683565275  }
   0xf   :  { %v755_v10 = vld [vmem:[%s1132_s1] ss:$0 sm:$0xff]  ;;  %v726_v52 = vmov 2475754826   ;;  %v727_v54 = vmov 2131351028  }
  0x10   :  { %v26_v1 = vshrl.u32 %v25_v0, 7  ;;  %v728_v56 = vmov 2102212464   ;;  %v729_v58 = vmov 920167782   ;;  %s731_s0 = smov [#allocation5]  }
  0x11   :  { %s596_s1 = sshll.u32 %s731_s0, 4  ;;  %s597_s1 = int_to_ptr.vmem [resolvable:$true] %s596_s1 }
  0x12   :  { %v27_v2 = vadd.s32 8, %v26_v1  ;;  %v28_v3 = vadd.s32 16, %v26_v1  ;;  %v30_v4 = vadd.s32 32, %v26_v1  ;;  %v37_v5 = vcvt.s32.f32 %v26_v1  ;;  %s700_s17 = scalar_lea.vmem %s597_s1, 640  ;;  %p705_p6 = scmp.lt.s32.totalorder %s597_s1, %s597_s1 }
  0x13   :  { %v29_v21 = vadd.s32 24, %v26_v1  ;;  %p701_p5 = scmp.ne.s32.totalorder %s597_s1, %s700_s17  ;;  %p706_p7 = scmp.lt.s32.totalorder %s700_s17, %s700_s17 }
  0x14   :  { %v38_v6 = vcvt.s32.f32 %v27_v2  ;;  %v39_v7 = vcvt.s32.f32 %v28_v3  ;;  %v41_v8 = vcvt.s32.f32 %v30_v4  ;;  %v49_v11 = vmul.f32 %v608_v9, %v37_v5 }
  0x15   :  { %v40_v30 = vcvt.s32.f32 %v29_v21  ;;  %v730_v2 = vmov 1326507024   ;;  %p707_p8 = por %p706_p7, %p705_p6 }
  0x16   :  { %v50_v12 = vmul.f32 %v608_v9, %v38_v6  ;;  %v51_v13 = vmul.f32 %v608_v9, %v39_v7  ;;  %v53_v14 = vmul.f32 %v608_v9, %v41_v8  ;;  %v758_v15 = vadd.f32 %v755_v10, %v49_v11 }
  0x17   :  { %v779_v39 = vmul.f32 %v608_v9, %v40_v30  ;;  %p708_p9 = pnand %p707_p8, %p701_p5 }
  0x18   :  { %v761_v16 = vadd.f32 %v755_v10, %v50_v12  ;;  %v764_v17 = vadd.f32 %v755_v10, %v51_v13  ;;  %v767_v18 = vadd.f32 %v755_v10, %v53_v14  ;;  %v66_v19 = vand.u32 2147483647, %v758_v15 }
  0x19   :  { %v69_v20 = vand.u32 2139095040, %v758_v15  ;;  %vm68_vm13 = vcmp.lt.s32.totalorder %v758_v15, 0 }
  0x1a   :  { %v170_v22 = vand.u32 2147483647, %v761_v16  ;;  %v173_v23 = vand.u32 2139095040, %v761_v16  ;;  %v73_v25 = vand.u32 8388607, %v66_v19  ;;  %v277_v28 = vand.u32 2139095040, %v764_v17 }
  0x1b   :  { %v70_v24 = vshrl.u32 %v69_v20, 23  ;;  %v274_v37 = vand.u32 2147483647, %v764_v17  ;;  %vm897_vm15 = vcmp.le.f32.partialorder %v66_v19, 0.7853982 }
  0x1c   :  { %v174_v26 = vshrl.u32 %v173_v23, 23  ;;  %v177_v27 = vand.u32 8388607, %v170_v22  ;;  %v278_v32 = vshrl.u32 %v277_v28, 23  ;;  %v74_v33 = vor.u32 8388608, %v73_v25 }
  0x1d   :  { %v610_v29 = vadd.s32 4294967169, %v70_v24  ;;  %v787_v47 = vand.u32 8388607, %v274_v37 }
  0x1e   :  { %v614_v31 = vadd.s32 4294967169, %v174_v26  ;;  %v178_v35 = vor.u32 8388608, %v177_v27  ;;  %v618_v38 = vadd.s32 4294967169, %v278_v32  ;;  %v781_v43 = vshll.u32 %v74_v33, 8 }
  0x1f   :  { %v76_v34 = vadd.s32 1, %v610_v29 }
  0x20   :  { %v180_v36 = vadd.s32 1, %v614_v31  ;;  %v783_v46 = vshll.u32 %v178_v35, 8  ;;  %v789_v48 = vadd.s32 1, %v618_v38 }
  0x21   :  { %vm77_vm0 = vcmp.gt.s32.totalorder %v76_v34, 0 }
  0x22   :  { %v78_v40 = vsel %vm77_vm0, %v76_v34, 0  ;;  %vm181_vm1 = vcmp.gt.s32.totalorder %v180_v36, 0  ;;  %vm285_vm6 = vcmp.gt.s32.totalorder %v789_v48, 0 }
  0x23   :  { %v79_v41 = vshrl.u32 %v78_v40, 5  ;;  %v80_v42 = vand.u32 31, %v78_v40  ;;  %v182_v44 = vsel %vm181_vm1, %v180_v36, 0 }
  0x24   :  { %v184_v45 = vand.u32 31, %v182_v44  ;;  %v796_v60 = vshrl.u32 %v182_v44, 5 }
  0x25   :  { %v81_v49 = vsub.s32 32, %v80_v42  ;;  %v83_v51 = vshll.u32 %v725_v50, %v80_v42  ;;  %v86_v53 = vshll.u32 %v726_v52, %v80_v42  ;;  %v89_v55 = vshll.u32 %v727_v54, %v80_v42 }
  0x26   :  { %v92_v57 = vshll.u32 %v728_v56, %v80_v42  ;;  %v95_v59 = vshll.u32 %v729_v58, %v80_v42  ;;  %vm98_vm2 = vcmp.lt.s32.totalorder %v79_v41, 1  ;;  %vm99_vm3 = vcmp.lt.s32.totalorder %v79_v41, 2 }
  0x27   :  { %v82_v61 = vshrl.u32 %v725_v50, %v81_v49  ;;  %v84_v62 = vshrl.u32 %v726_v52, %v81_v49  ;;  %v87_v63 = vshrl.u32 %v727_v54, %v81_v49  ;;  %v90_v0 = vshrl.u32 %v728_v56, %v81_v49 }
  0x28   :  { %v93_v1 = vshrl.u32 %v729_v58, %v81_v49  ;;  %v96_v3 = vshrl.u32 %v730_v2, %v81_v49  ;;  %vm101_vm4 = vcmp.lt.s32.totalorder %v79_v41, 4  ;;  %v185_v7 = vsub.s32 32, %v184_v45 }
  0x29   :  { %v85_v4 = vor.u32 %v84_v62, %v83_v51  ;;  %v88_v5 = vor.u32 %v87_v63, %v86_v53  ;;  %v91_v6 = vor.u32 %v90_v0, %v89_v55  ;;  %vm100_vm5 = vcmp.lt.s32.totalorder %v79_v41, 3 }
  0x2a   :  { %v94_v8 = vor.u32 %v93_v1, %v92_v57  ;;  %v97_v9 = vor.u32 %v96_v3, %v95_v59  ;;  %v187_v11 = vshll.u32 %v725_v50, %v184_v45  ;;  %v190_v25 = vshll.u32 %v726_v52, %v184_v45 }
  0x2b   :  { %v102_v12 = vsel %vm98_vm2, %v82_v61, %v85_v4  ;;  %v103_v13 = vsel %vm101_vm4, %v91_v6, 2102212464  ;;  %v106_v14 = vsel %vm98_vm2, %v85_v4, %v88_v5  ;;  %v110_v20 = vsel %vm98_vm2, %v88_v5, %v91_v6 }
  0x2c   :  { %v104_v21 = vsel %vm100_vm5, %v88_v5, %v103_v13  ;;  %v107_v23 = vsel %vm101_vm4, %v94_v8, 920167782  ;;  %v111_v24 = vsel %vm101_vm4, %v97_v9, 1326507024  ;;  %v186_v28 = vshrl.u32 %v725_v50, %v185_v7 }
  0x2d   :  { %v108_v26 = vsel %vm100_vm5, %v91_v6, %v107_v23  ;;  %v112_v27 = vsel %vm100_vm5, %v94_v8, %v111_v24  ;;  %v188_v29 = vshrl.u32 %v726_v52, %v185_v7  ;;  %v105_v30 = vsel %vm99_vm3, %v102_v12, %v104_v21 }
  0x2e   :  { %v109_v31 = vsel %vm99_vm3, %v106_v14, %v108_v26  ;;  %v113_v32 = vsel %vm99_vm3, %v110_v20, %v112_v27  ;;  %v191_v33 = vshrl.u32 %v727_v54, %v185_v7  ;;  %v193_v44 = vshll.u32 %v727_v54, %v184_v45 }
  0x2f   :  { %v817_v34 = vmul.u32.u64.low %v781_v43, %v113_v32  ;;  %v818_v35 = vmul.u32.u64.high %v781_v43, %v113_v32, %v817_v34  ;;  %v821_v36 = vmul.u32.u64.low %v781_v43, %v109_v31  ;;  %v822_v38 = vmul.u32.u64.high %v781_v43, %v109_v31, %v821_v36 }
  0x30   :  { %v189_v40 = vor.u32 %v188_v29, %v187_v11  ;;  %v192_v42 = vor.u32 %v191_v33, %v190_v25  ;;  %v194_v49 = vshrl.u32 %v728_v56, %v185_v7  ;;  %v196_v41 = vshll.u32 %v728_v56, %v184_v45 }
  0x31   :  { %v197_v51 = vshrl.u32 %v729_v58, %v185_v7  ;;  %v199_v53 = vshll.u32 %v729_v58, %v184_v45  ;;  %v200_v55 = vshrl.u32 %v730_v2, %v185_v7  ;;  %v121_v57 = vmul.u32 %v781_v43, %v105_v30 }
  0x32   :  { %v195_v59 = vor.u32 %v194_v49, %v193_v44  ;;  %vm202_vm7 = vcmp.lt.s32.totalorder %v796_v60, 1  ;;  %vm203_vm8 = vcmp.lt.s32.totalorder %v796_v60, 2  ;;  %vm123_vm9 = vc.u32 %v818_v35, %v821_v36 }
  0x33   :  { %v124_v61 = vadd.s32 1, %v822_v38  ;;  %v198_v62 = vor.u32 %v197_v51, %v196_v41  ;;  %vm204_vm10 = vcmp.lt.s32.totalorder %v796_v60, 3  ;;  %v201_v63 = vor.u32 %v200_v55, %v199_v53 }
  0x34   :  { %vm205_vm11 = vcmp.lt.s32.totalorder %v796_v60, 4  ;;  %v206_v45 = vsel %vm202_vm7, %v186_v28, %v189_v40  ;;  %v210_v0 = vsel %vm202_vm7, %v189_v40, %v192_v42  ;;  %v214_v4 = vsel %vm202_vm7, %v192_v42, %v195_v59 }
  0x35   :  { %v125_v43 = vsel %vm123_vm9, %v124_v61, %v822_v38  ;;  %v207_v1 = vsel %vm205_vm11, %v195_v59, 2102212464  ;;  %v211_v3 = vsel %vm205_vm11, %v198_v62, 920167782  ;;  %v215_v8 = vsel %vm205_vm11, %v201_v63, 1326507024 }
  0x36   :  { %v126_v5 = vadd.s32 %v125_v43, %v121_v57  ;;  %v208_v6 = vsel %vm204_vm10, %v192_v42, %v207_v1  ;;  %v212_v7 = vsel %vm204_vm10, %v195_v59, %v211_v3  ;;  %v216_v12 = vsel %vm204_vm10, %v198_v62, %v215_v8 }
  0x37   :  { %v209_v9 = vsel %vm203_vm8, %v206_v45, %v208_v6  ;;  %v213_v11 = vsel %vm203_vm8, %v210_v0, %v212_v7  ;;  %v286_v13 = vsel %vm285_vm6, %v789_v48, 0  ;;  %v217_v20 = vsel %vm203_vm8, %v214_v4, %v216_v12 }
  0x38   :  { %v127_v14 = vadd.s32 536870912, %v126_v5  ;;  %v850_v21 = vmul.u32.u64.low %v783_v46, %v213_v11  ;;  %v851_v23 = vmul.u32.u64.high %v783_v46, %v213_v11, %v850_v21  ;;  %v856_v24 = vadd.f32 %v755_v10, %v779_v39 }
  0x39   :  { %v859_v25 = vmul.u32.u64.low %v783_v46, %v217_v20  ;;  %v860_v26 = vmul.u32.u64.high %v783_v46, %v217_v20, %v859_v25  ;;  %v282_v48 = vor.u32 8388608, %v787_v47  ;;  %v288_v28 = vand.u32 31, %v286_v13 }
  0x3a   :  { %v128_v27 = vshrl.u32 %v127_v14, 30  ;;  %v225_v60 = vmul.u32 %v783_v46, %v209_v9  ;;  %v228_v30 = vadd.s32 1, %v851_v23  ;;  %v378_v10 = vand.u32 2147483647, %v856_v24 }
  0x3b   :  { %v289_v31 = vsub.s32 32, %v288_v28  ;;  %vm227_vm12 = vc.u32 %v860_v26, %v850_v21  ;;  %v381_v39 = vand.u32 2139095040, %v856_v24  ;;  %v873_v33 = vshrl.u32 %v286_v13, 5 }
  0x3c   :  { %v129_v29 = vshll.u32 %v128_v27, 30  ;;  %v229_v47 = vsel %vm227_vm12, %v228_v30, %v851_v23  ;;  %v875_v46 = vshll.u32 %v282_v48, 8  ;;  %v291_v38 = vshll.u32 %v725_v50, %v288_v28 }
  0x3d   :  { %v230_v34 = vadd.s32 %v229_v47, %v225_v60  ;;  %v292_v40 = vshrl.u32 %v726_v52, %v289_v31  ;;  %v294_v42 = vshll.u32 %v726_v52, %v288_v28  ;;  %v295_v49 = vshrl.u32 %v727_v54, %v289_v31 }
  0x3e   :  { %v870_v32 = vsub.s32 %v126_v5, %v129_v29  ;;  %v297_v41 = vshll.u32 %v727_v54, %v288_v28  ;;  %v298_v51 = vshrl.u32 %v728_v56, %v289_v31  ;;  %v122_v53 = vadd.s32 %v821_v36, %v818_v35 }
  0x3f   :  { %v231_v55 = vadd.s32 536870912, %v230_v34  ;;  %v300_v57 = vshll.u32 %v728_v56, %v288_v28  ;;  %v382_v59 = vshrl.u32 %v381_v39, 23  ;;  %v152_v62 = vsub.s32 4, %v128_v27 }
  0x40   :  { %v132_v44 = vsub.s32 0, %v870_v32  ;;  %v301_v63 = vshrl.u32 %v729_v58, %v289_v31  ;;  %vm309_vm14 = vcmp.lt.s32.totalorder %v873_v33, 4  ;;  %v290_v0 = vshrl.u32 %v725_v50, %v289_v31 }
  0x41   :  { %v890_v45 = vshrl.u32 %v231_v55, 30  ;;  %v303_v43 = vshll.u32 %v729_v58, %v288_v28  ;;  %v304_v1 = vshrl.u32 %v730_v2, %v289_v31  ;;  %v293_v3 = vor.u32 %v292_v40, %v291_v38 }
  0x42   :  { %v611_v61 = vmin.u32 %v132_v44, %v870_v32  ;;  %v296_v4 = vor.u32 %v295_v49, %v294_v42  ;;  %v299_v5 = vor.u32 %v298_v51, %v297_v41  ;;  %v302_v7 = vor.u32 %v301_v63, %v300_v57 }
  0x43   :  { %v233_v6 = vshll.u32 %v890_v45, 30  ;;  %vm306_vm0 = vcmp.lt.s32.totalorder %v873_v33, 1  ;;  %vm308_vm1 = vcmp.lt.s32.totalorder %v873_v33, 3  ;;  %v305_v9 = vor.u32 %v304_v1, %v303_v43 }
  0x44   :  { %v134_v36 = vclz %v611_v61  ;;  %v311_v11 = vsel %vm309_vm14, %v299_v5, 2102212464  ;;  %v622_v19 = vadd.s32 4294967169, %v382_v59  ;;  %v153_v12 = vsel %vm68_vm13, %v152_v62, %v128_v27 }
  0x45   :  { %v908_v13 = vsub.s32 %v230_v34, %v233_v6  ;;  %vm307_vm2 = vcmp.lt.s32.totalorder %v873_v33, 2  ;;  %v315_v14 = vsel %vm309_vm14, %v302_v7, 920167782  ;;  %v310_v20 = vsel %vm306_vm0, %v290_v0, %v293_v3 }
  0x46   :  { %v612_v8 = vadd.s32 4294967294, %v134_v36  ;;  %v314_v23 = vsel %vm306_vm0, %v293_v3, %v296_v4  ;;  %v316_v25 = vsel %vm308_vm1, %v299_v5, %v315_v14  ;;  %v312_v28 = vsel %vm308_vm1, %v296_v4, %v311_v11 }
  0x47   :  { %v236_v27 = vsub.s32 0, %v908_v13  ;;  %v318_v60 = vsel %vm306_vm0, %v296_v4, %v299_v5  ;;  %v319_v39 = vsel %vm309_vm14, %v305_v9, 1326507024  ;;  %v317_v34 = vsel %vm307_vm2, %v314_v23, %v316_v25 }
  0x48   :  { %vm613_vm3 = vcmp.lt.s32.totalorder %v612_v8, 0  ;;  %v320_v38 = vsel %vm308_vm1, %v302_v7, %v319_v39  ;;  %v934_v40 = vand.u32 8388607, %v378_v10  ;;  %v388_v49 = vadd.s32 1, %v622_v19 }
  0x49   :  { %v137_v48 = vsel %vm613_vm3, 0, %v612_v8  ;;  %v615_v47 = vmin.u32 %v236_v27, %v908_v13  ;;  %v155_v41 = vsel %vm897_vm15, 0, %v153_v12  ;;  %v313_v55 = vsel %vm307_vm2, %v310_v20, %v312_v28 }
  0x4a   :  { %v138_v29 = vsub.s32 32, %v137_v48  ;;  %v139_v30 = vshll.u32 %v870_v32, %v137_v48  ;;  %v142_v31 = vsub.s32 4294967266, %v137_v48  ;;  %v321_v32 = vsel %vm307_vm2, %v318_v60, %v320_v38 }
  0x4b   :  { %v238_v51 = vclz %v615_v47  ;;  %v943_v61 = vmul.u32.u64.low %v875_v46, %v321_v32  ;;  %v944_v62 = vmul.u32.u64.high %v875_v46, %v321_v32, %v943_v61  ;;  %vm389_vm4 = vcmp.gt.s32.totalorder %v388_v49, 0 }
  0x4c   :  { %v140_v42 = vshrl.u32 %v122_v53, %v138_v29  ;;  %v143_v44 = vadd.s32 127, %v142_v31  ;;  %v947_v53 = vmul.u32.u64.low %v875_v46, %v317_v34  ;;  %v948_v0 = vmul.u32.u64.high %v875_v46, %v317_v34, %v947_v53 }
  0x4d   :  { %v616_v63 = vadd.s32 4294967294, %v238_v51  ;;  %v386_v36 = vor.u32 8388608, %v934_v40  ;;  %v390_v3 = vsel %vm389_vm4, %v388_v49, 0  ;;  %v952_v33 = vadd.s32 3, %v155_v41 }
  0x4e   :  { %v141_v57 = vor.u32 %v140_v42, %v139_v30  ;;  %v144_v59 = vshll.u32 %v143_v44, 23  ;;  %v226_v4 = vadd.s32 %v850_v21, %v860_v26  ;;  %v392_v5 = vand.u32 31, %v390_v3 }
  0x4f   :  { %vm617_vm5 = vcmp.lt.s32.totalorder %v616_v63, 0  ;;  %v329_v8 = vmul.u32 %v875_v46, %v313_v55  ;;  %vm331_vm6 = vc.u32 %v944_v62, %v947_v53  ;;  %vm172_vm7 = vcmp.lt.s32.totalorder %v761_v16, 0 }
  0x50   :  { %v145_v43 = vor.u32 4788187, %v144_v59  ;;  %v148_v1 = vcvt.s32.f32 %v141_v57  ;;  %v241_v7 = vsel %vm617_vm5, 0, %v616_v63  ;;  %v332_v12 = vadd.s32 1, %v948_v0 }
  0x51   :  { %v242_v9 = vsub.s32 32, %v241_v7  ;;  %v243_v11 = vshll.u32 %v908_v13, %v241_v7  ;;  %v246_v19 = vsub.s32 4294967266, %v241_v7  ;;  %v256_v21 = vsub.s32 4, %v890_v45 }
  0x52   :  { %v146_v6 = vand.u32 2147483647, %v145_v43  ;;  %v963_v26 = vshrl.u32 %v390_v3, 5  ;;  %v393_v20 = vsub.s32 32, %v392_v5  ;;  %v333_v46 = vsel %vm331_vm6, %v332_v12, %v948_v0 }
  0x53   :  { %v244_v23 = vshrl.u32 %v226_v4, %v242_v9  ;;  %v247_v25 = vadd.s32 127, %v246_v19  ;;  %v395_v48 = vshll.u32 %v725_v50, %v392_v5  ;;  %v334_v28 = vadd.s32 %v333_v46, %v329_v8 }
  0x54   :  { %v149_v14 = vmul.f32 %v148_v1, %v146_v6  ;;  %v396_v60 = vshrl.u32 %v726_v52, %v393_v20  ;;  %v398_v13 = vshll.u32 %v726_v52, %v392_v5  ;;  %vm971_vm8 = vcmp.le.f32.partialorder %v170_v22, 0.7853982 }
  0x55   :  { %v245_v30 = vor.u32 %v244_v23, %v243_v11  ;;  %v248_v31 = vshll.u32 %v247_v25, 23  ;;  %v399_v39 = vshrl.u32 %v727_v54, %v393_v20  ;;  %v401_v47 = vshll.u32 %v727_v54, %v392_v5 }
  0x56   :  { %v150_v27 = vxor.u32 2147483648, %v149_v14  ;;  %v335_v38 = vadd.s32 536870912, %v334_v28  ;;  %v402_v40 = vshrl.u32 %v728_v56, %v393_v20  ;;  %v404_v42 = vshll.u32 %v728_v56, %v392_v5 }
  0x57   :  { %v249_v44 = vor.u32 4788187, %v248_v31  ;;  %v252_v32 = vcvt.s32.f32 %v245_v30  ;;  %v397_v49 = vor.u32 %v396_v60, %v395_v48  ;;  %v400_v51 = vor.u32 %v399_v39, %v398_v13 }
  0x58   :  { %v151_v34 = vsel %vm68_vm13, %v150_v27, %v149_v14  ;;  %v984_v41 = vshrl.u32 %v335_v38, 30  ;;  %v405_v55 = vshrl.u32 %v729_v58, %v393_v20  ;;  %v407_v59 = vshll.u32 %v729_v58, %v392_v5 }
  0x59   :  { %v154_v22 = vsel %vm897_vm15, %v758_v15, %v151_v34  ;;  %v250_v57 = vand.u32 2147483647, %v249_v44  ;;  %v408_v61 = vshrl.u32 %v730_v2, %v393_v20  ;;  %v257_v35 = vsel %vm172_vm7, %v256_v21, %v890_v45 }
  0x5a   :  { %660 = vcosq.f32 %v154_v22  ;;  %v337_v63 = vshll.u32 %v984_v41, 30  ;;  %v406_v0 = vor.u32 %v405_v55, %v404_v42  ;;  %vm410_vm9 = vcmp.lt.s32.totalorder %v963_v26, 1 }
  0x5b   :  { %662 = vsinq.f32 %v154_v22  ;;  %v253_v43 = vmul.f32 %v252_v32, %v250_v57  ;;  %v394_v1 = vshrl.u32 %v725_v50, %v393_v20  ;;  %v403_v3 = vor.u32 %v402_v40, %v401_v47 }
  0x5c   :  { %v995_v4 = vshll.u32 %v386_v36, 8  ;;  %v997_v6 = vsub.s32 %v334_v28, %v337_v63  ;;  %v409_v5 = vor.u32 %v408_v61, %v407_v59  ;;  %vm412_vm10 = vcmp.lt.s32.totalorder %v963_v26, 3 }
  0x5d   :  { %vm413_vm11 = vcmp.lt.s32.totalorder %v963_v26, 4  ;;  %v254_v7 = vxor.u32 2147483648, %v253_v43  ;;  %vm411_vm12 = vcmp.lt.s32.totalorder %v963_v26, 2  ;;  %v418_v8 = vsel %vm410_vm9, %v397_v49, %v400_v51 }
  0x5e   :  { %v415_v45 = vsel %vm413_vm11, %v403_v3, 2102212464  ;;  %v160_v9 = vand.u32 3, %v952_v33  ;;  %v259_v36 = vsel %vm971_vm8, 0, %v257_v35  ;;  %v340_v11 = vsub.s32 0, %v997_v6 }
  0x5f   :  { %v419_v19 = vsel %vm413_vm11, %v406_v0, 920167782  ;;  %v255_v12 = vsel %vm172_vm7, %v254_v7, %v253_v43  ;;  %v414_v14 = vsel %vm410_vm9, %v394_v1, %v397_v49  ;;  %v416_v21 = vsel %vm412_vm10, %v400_v51, %v415_v45 }
  0x60   :  { %v420_v33 = vsel %vm412_vm10, %v403_v3, %v419_v19  ;;  %v258_v20 = vsel %vm971_vm8, %v761_v16, %v255_v12  ;;  %v619_v23 = vmin.u32 %v340_v11, %v997_v6  ;;  %v422_v46 = vsel %vm410_vm9, %v400_v51, %v403_v3 }
  0x61   :  { %v421_v25 = vsel %vm411_vm12, %v418_v8, %v420_v33  ;;  %664 = vcosq.f32 %v258_v20  ;;  %v423_v48 = vsel %vm413_vm11, %v409_v5, 1326507024  ;;  %vm158_vm13 = vweird.f32 %v758_v15 }
  0x62   :  { %v1031_v27 = vmul.u32.u64.low %v995_v4, %v421_v25  ;;  %v1032_v28 = vmul.u32.u64.high %v995_v4, %v421_v25, %v1031_v27  ;;  %666 = vsinq.f32 %v258_v20  ;;  %v342_v60 = vclz %v619_v23 }
  0x63   :  { %vm161_vm14 = vcmp.lt.s32.totalorder %v160_v9, 2  ;;  %vm162_vm15 = vcmp.eq.s32.totalorder %v160_v9, 0  ;;  %v263_v13 = vadd.s32 3, %v259_v36  ;;  %v424_v29 = vsel %vm412_vm10, %v406_v0, %v423_v48 }
  0x64   :  { %v620_v30 = vadd.s32 4294967294, %v342_v60  ;;  %v417_v31 = vsel %vm411_vm12, %v414_v14, %v416_v21  ;;  %v425_v39 = vsel %vm411_vm12, %v422_v46, %v424_v29  ;;  %v485_v47 = vand.u32 2139095040, %v767_v18 }
  0x65   :  { %vm165_vm0 = vcmp.eq.s32.totalorder %v160_v9, 2  ;;  %v330_v38 = vadd.s32 %v947_v53, %v944_v62  ;;  %v1046_v40 = vmul.u32.u64.low %v995_v4, %v425_v39  ;;  %v1047_v42 = vmul.u32.u64.high %v995_v4, %v425_v39, %v1046_v40 }
  0x66   :  { %vm621_vm1 = vcmp.lt.s32.totalorder %v620_v30, 0  ;;  %v436_v32 = vadd.s32 1, %v1032_v28  ;;  %v486_v49 = vshrl.u32 %v485_v47, 23  ;;  %v264_v26 = vand.u32 3, %v263_v13 }
  0x67   :  { %v661_v34 = vpop.eup %660  ;;  %v345_v55 = vsel %vm621_vm1, 0, %v620_v30  ;;  %v433_v57 = vmul.u32 %v995_v4, %v417_v31  ;;  %v360_v63 = vsub.s32 4, %v984_v41  ;;  %vm435_vm2 = vc.u32 %v1047_v42, %v1031_v27 }
  0x68   :  { %v663_v22 = vpop.eup %662  ;;  %v166_v44 = vxor.u32 2147483648, %v661_v34  ;;  %v346_v61 = vsub.s32 32, %v345_v55  ;;  %v347_v35 = vshll.u32 %v997_v6, %v345_v55  ;;  %v350_v62 = vsub.s32 4294967266, %v345_v55 }
  0x69   :  { %v163_v51 = vxor.u32 2147483648, %v663_v22  ;;  %v626_v0 = vadd.s32 4294967169, %v486_v49  ;;  %v437_v5 = vsel %vm435_vm2, %v436_v32, %v1032_v28  ;;  %vm276_vm3 = vcmp.lt.s32.totalorder %v764_v17, 0 }
  0x6a   :  { %v167_v59 = vsel %vm165_vm0, %v166_v44, %v663_v22  ;;  %v348_v1 = vshrl.u32 %v330_v38, %v346_v61  ;;  %v351_v3 = vadd.s32 127, %v350_v62  ;;  %v438_v7 = vadd.s32 %v437_v5, %v433_v57 }
  0x6b   :  { %v164_v53 = vsel %vm162_vm15, %v661_v34, %v163_v51  ;;  %v492_v6 = vadd.s32 1, %v626_v0  ;;  %vm266_vm4 = vcmp.eq.s32.totalorder %v264_v26, 0  ;;  %vm269_vm5 = vcmp.eq.s32.totalorder %v264_v26, 2 }
  0x6c   :  { %v168_v43 = vsel %vm161_vm14, %v164_v53, %v167_v59  ;;  %v349_v45 = vor.u32 %v348_v1, %v347_v35  ;;  %v352_v8 = vshll.u32 %v351_v3, 23  ;;  %v439_v36 = vadd.s32 536870912, %v438_v7 }
  0x6d   :  { %v169_v4 = vsel %vm158_vm13, nan, %v168_v43  ;;  %vm493_vm6 = vcmp.gt.s32.totalorder %v492_v6, 0  ;;  %v361_v12 = vsel %vm276_vm3, %v360_v63, %v984_v41  ;;  %v482_v20 = vand.u32 2147483647, %v767_v18 }
  0x6e   :  { %586 = vst [vmem:[#allocation5] sm:$0xff] %v169_v4  ;;  %v665_v9 = vpop.eup %664  ;;  %v353_v11 = vor.u32 4788187, %v352_v8  ;;  %v356_v19 = vcvt.s32.f32 %v349_v45  ;;  %v494_v15 = vsel %vm493_vm6, %v492_v6, 0  ;;  %v1064_v33 = vshrl.u32 %v439_v36, 30 }
  0x6f   :  { %v667_v14 = vpop.eup %666  ;;  %v270_v21 = vxor.u32 2147483648, %v665_v9  ;;  %v496_v23 = vand.u32 31, %v494_v15  ;;  %vm262_vm7 = vweird.f32 %v761_v16  ;;  %vm265_vm8 = vcmp.lt.s32.totalorder %v264_v26, 2 }
  0x70   :  { %v267_v25 = vxor.u32 2147483648, %v667_v14  ;;  %v354_v46 = vand.u32 2147483647, %v353_v11  ;;  %vm1071_vm9 = vcmp.le.f32.partialorder %v274_v37, 0.7853982  ;;  %v441_v41 = vshll.u32 %v1064_v33, 30 }
  0x71   :  { %v271_v48 = vsel %vm269_vm5, %v270_v21, %v667_v14  ;;  %v497_v60 = vsub.s32 32, %v496_v23  ;;  %v363_v16 = vsel %vm1071_vm9, 0, %v361_v12  ;;  %v489_v39 = vand.u32 8388607, %v482_v20 }
  0x72   :  { %v268_v13 = vsel %vm266_vm4, %v665_v9, %v267_v25  ;;  %v357_v29 = vmul.f32 %v356_v19, %v354_v46  ;;  %v442_v31 = vsub.s32 %v438_v7, %v441_v41  ;;  %v499_v47 = vshll.u32 %v725_v50, %v496_v23 }
  0x73   :  { %v272_v30 = vsel %vm265_vm8, %v268_v13, %v271_v48  ;;  %v500_v38 = vshrl.u32 %v726_v52, %v497_v60  ;;  %v502_v40 = vshll.u32 %v726_v52, %v496_v23  ;;  %v367_v22 = vadd.s32 3, %v363_v16 }
  0x74   :  { %v273_v37 = vsel %vm262_vm7, nan, %v272_v30  ;;  %v358_v34 = vxor.u32 2147483648, %v357_v29  ;;  %v444_v44 = vsub.s32 0, %v442_v31  ;;  %v495_v32 = vshrl.u32 %v494_v15, 5 }
  0x75   :  { %v503_v49 = vshrl.u32 %v727_v54, %v497_v60  ;;  %587 = vst [vmem:[#allocation5 + $0x8] sm:$0xff] %v273_v37  ;;  %v505_v26 = vshll.u32 %v727_v54, %v496_v23  ;;  %v506_v55 = vshrl.u32 %v728_v56, %v497_v60  ;;  %v508_v57 = vshll.u32 %v728_v56, %v496_v23 }
  0x76   :  { %v359_v51 = vsel %vm276_vm3, %v358_v34, %v357_v29  ;;  %v623_v52 = vmin.u32 %v444_v44, %v442_v31  ;;  %v490_v61 = vor.u32 8388608, %v489_v39  ;;  %v501_v35 = vor.u32 %v500_v38, %v499_v47 }
  0x77   :  { %v362_v59 = vsel %vm1071_vm9, %v764_v17, %v359_v51  ;;  %v504_v62 = vor.u32 %v503_v49, %v502_v40  ;;  %v509_v53 = vshrl.u32 %v729_v58, %v497_v60  ;;  %v511_v63 = vshll.u32 %v729_v58, %v496_v23 }
  0x78   :  { %668 = vcosq.f32 %v362_v59  ;;  %v434_v54 = vadd.s32 %v1031_v27, %v1047_v42  ;;  %v446_v0 = vclz %v623_v52  ;;  %v498_v56 = vshrl.u32 %v725_v50, %v497_v60 }
  0x79   :  { %670 = vsinq.f32 %v362_v59  ;;  %v507_v43 = vor.u32 %v506_v55, %v505_v26  ;;  %v510_v1 = vor.u32 %v509_v53, %v508_v57  ;;  %v512_v3 = vshrl.u32 %v730_v2, %v497_v60 }
  0x7a   :  { %vm514_vm10 = vcmp.lt.s32.totalorder %v495_v32, 1  ;;  %v624_v5 = vadd.s32 4294967294, %v446_v0  ;;  %vm516_vm11 = vcmp.lt.s32.totalorder %v495_v32, 3  ;;  %vm517_vm12 = vcmp.lt.s32.totalorder %v495_v32, 4 }
  0x7b   :  { %v530_v4 = vshll.u32 %v490_v61, 8  ;;  %v513_v7 = vor.u32 %v512_v3, %v511_v63  ;;  %vm515_vm13 = vcmp.lt.s32.totalorder %v495_v32, 2  ;;  %v519_v6 = vsel %vm517_vm12, %v507_v43, 2102212464 }
  0x7c   :  { %v522_v58 = vsel %vm514_vm10, %v501_v35, %v504_v62  ;;  %vm625_vm14 = vcmp.lt.s32.totalorder %v624_v5, 0  ;;  %v518_v45 = vsel %vm514_vm10, %v498_v56, %v501_v35  ;;  %v520_v27 = vsel %vm516_vm11, %v504_v62, %v519_v6 }
  0x7d   :  { %v523_v42 = vsel %vm517_vm12, %v510_v1, 920167782  ;;  %v449_v8 = vsel %vm625_vm14, 0, %v624_v5  ;;  %v526_v36 = vsel %vm514_vm10, %v504_v62, %v507_v43  ;;  %v527_v9 = vsel %vm517_vm12, %v513_v7, 1326507024 }
  0x7e   :  { %v524_v50 = vsel %vm516_vm11, %v507_v43, %v523_v42  ;;  %v450_v2 = vsub.s32 32, %v449_v8  ;;  %v451_v11 = vshll.u32 %v442_v31, %v449_v8  ;;  %v454_v19 = vsub.s32 4294967266, %v449_v8 }
  0x7f   :  { %v525_v12 = vsel %vm515_vm13, %v522_v58, %v524_v50  ;;  %v368_v15 = vand.u32 3, %v367_v22  ;;  %v528_v14 = vsel %vm516_vm11, %v510_v1, %v527_v9  ;;  %v521_v48 = vsel %vm515_vm13, %v518_v45, %v520_v27 }
  0x80   :  { %v1103_v21 = vmul.u32.u64.low %v530_v4, %v525_v12  ;;  %v1104_v23 = vmul.u32.u64.high %v530_v4, %v525_v12, %v1103_v21  ;;  %v452_v25 = vshrl.u32 %v434_v54, %v450_v2  ;;  %v455_v46 = vadd.s32 127, %v454_v19 }
  0x81   :  { %v529_v28 = vsel %vm515_vm13, %v526_v36, %v528_v14  ;;  %v537_v16 = vmul.u32 %v530_v4, %v521_v48  ;;  %vm373_vm15 = vcmp.eq.s32.totalorder %v368_v15, 2  ;;  %vm370_vm0 = vcmp.eq.s32.totalorder %v368_v15, 0 }
  0x82   :  { %v1108_v41 = vmul.u32.u64.low %v530_v4, %v529_v28  ;;  %v1109_v60 = vmul.u32.u64.high %v530_v4, %v529_v28, %v1108_v41  ;;  %v453_v13 = vor.u32 %v452_v25, %v451_v11  ;;  %v456_v29 = vshll.u32 %v455_v46, 23 }
  0x83   :  { %v540_v30 = vadd.s32 1, %v1104_v23  ;;  %vm369_vm2 = vcmp.lt.s32.totalorder %v368_v15, 2  ;;  %vm366_vm3 = vweird.f32 %v764_v17  ;;  %vm380_vm4 = vcmp.lt.s32.totalorder %v856_v24, 0 }
  0x84   :  { %v457_v39 = vor.u32 4788187, %v456_v29  ;;  %v460_v47 = vcvt.s32.f32 %v453_v13  ;;  %vm539_vm1 = vc.u32 %v1109_v60, %v1103_v21  ;;  %v464_v55 = vsub.s32 4, %v1064_v33 }
  0x85   :  { %v669_v31 = vpop.eup %668  ;;  %v541_v22 = vsel %vm539_vm1, %v540_v30, %v1104_v23  ;;  %vm379_vm5 = vcmp.le.f32.partialorder %v378_v10, 0.7853982  ;;  %v538_v10 = vadd.s32 %v1103_v21, %v1109_v60  ;;  %vm470_vm10 = vweird.f32 %v856_v24 }
  0x86   :  { %v671_v37 = vpop.eup %670  ;;  %v374_v34 = vxor.u32 2147483648, %v669_v31  ;;  %v458_v40 = vand.u32 2147483647, %v457_v39  ;;  %v542_v32 = vadd.s32 %v541_v22, %v537_v16  ;;  %v465_v17 = vsel %vm380_vm4, %v464_v55, %v1064_v33 }
  0x87   :  { %v371_v38 = vxor.u32 2147483648, %v671_v37  ;;  %v467_v54 = vsel %vm379_vm5, 0, %v465_v17  ;;  %vm484_vm11 = vcmp.lt.s32.totalorder %v767_v18, 0  ;;  %vm483_vm12 = vcmp.le.f32.partialorder %v482_v20, 0.7853982 }
  0x88   :  { %v375_v44 = vsel %vm373_vm15, %v374_v34, %v671_v37  ;;  %v461_v51 = vmul.f32 %v460_v47, %v458_v40  ;;  %v543_v57 = vadd.s32 536870912, %v542_v32  ;;  %v471_v56 = vadd.s32 3, %v467_v54 }
  0x89   :  { %v372_v49 = vsel %vm370_vm0, %v669_v31, %v371_v38  ;;  %vm574_vm0 = vweird.f32 %v767_v18 }
  0x8a   :  { %v376_v26 = vsel %vm369_vm2, %v372_v49, %v375_v44  ;;  %v462_v52 = vxor.u32 2147483648, %v461_v51  ;;  %v544_v61 = vshrl.u32 %v543_v57, 30  ;;  %v472_v3 = vand.u32 3, %v471_v56 }
  0x8b   :  { %v377_v59 = vsel %vm366_vm3, nan, %v376_v26 }
  0x8c   :  { %588 = vst [vmem:[#allocation5 + $0x10] sm:$0xff] %v377_v59  ;;  %v463_v35 = vsel %vm380_vm4, %v462_v52, %v461_v51  ;;  %v545_v53 = vshll.u32 %v544_v61, 30  ;;  %vm477_vm7 = vcmp.eq.s32.totalorder %v472_v3, 2  ;;  %vm474_vm8 = vcmp.eq.s32.totalorder %v472_v3, 0 }
  0x8d   :  { %v466_v62 = vsel %vm379_vm5, %v856_v24, %v463_v35  ;;  %vm473_vm9 = vcmp.lt.s32.totalorder %v472_v3, 2  ;;  %v568_v25 = vsub.s32 4, %v544_v61 }
  0x8e   :  { %672 = vcosq.f32 %v466_v62  ;;  %v546_v63 = vsub.s32 %v542_v32, %v545_v53 }
  0x8f   :  { %674 = vsinq.f32 %v466_v62  ;;  %v569_v24 = vsel %vm484_vm11, %v568_v25, %v544_v61 }
  0x90   :  { %v548_v0 = vsub.s32 0, %v546_v63  ;;  %v571_v41 = vsel %vm483_vm12, 0, %v569_v24 }
  0x91   :  { %v575_v60 = vadd.s32 3, %v571_v41 }
  0x92   :  { %v627_v43 = vmin.u32 %v548_v0, %v546_v63 }
  0x93   :  { %v576_v13 = vand.u32 3, %v575_v60 }
  0x94   :  { %v550_v1 = vclz %v627_v43 }
  0x95   :  { %vm581_vm13 = vcmp.eq.s32.totalorder %v576_v13, 2  ;;  %vm578_vm14 = vcmp.eq.s32.totalorder %v576_v13, 0  ;;  %vm577_vm15 = vcmp.lt.s32.totalorder %v576_v13, 2 }
  0x96   :  { %v628_v5 = vadd.s32 4294967294, %v550_v1 }
  0x98   :  { %vm629_vm6 = vcmp.lt.s32.totalorder %v628_v5, 0 }
  0x99   :  { %v553_v4 = vsel %vm629_vm6, 0, %v628_v5 }
  0x9a   :  { %v554_v33 = vsub.s32 32, %v553_v4  ;;  %v555_v6 = vshll.u32 %v546_v63, %v553_v4  ;;  %v558_v58 = vsub.s32 4294967266, %v553_v4 }
  0x9b   :  { %v673_v7 = vpop.eup %672 }
  0x9c   :  { %v675_v45 = vpop.eup %674  ;;  %v478_v27 = vxor.u32 2147483648, %v673_v7  ;;  %v556_v8 = vshrl.u32 %v538_v10, %v554_v33  ;;  %v559_v50 = vadd.s32 127, %v558_v58 }
  0x9d   :  { %v475_v42 = vxor.u32 2147483648, %v675_v45 }
  0x9e   :  { %v479_v36 = vsel %vm477_vm7, %v478_v27, %v675_v45  ;;  %v557_v2 = vor.u32 %v556_v8, %v555_v6  ;;  %v560_v11 = vshll.u32 %v559_v50, 23 }
  0x9f   :  { %v476_v9 = vsel %vm474_vm8, %v673_v7, %v475_v42 }
  0xa0   :  { %v480_v19 = vsel %vm473_vm9, %v476_v9, %v479_v36  ;;  %v561_v15 = vor.u32 4788187, %v560_v11  ;;  %v564_v14 = vcvt.s32.f32 %v557_v2 }
  0xa1   :  { %v481_v12 = vsel %vm470_vm10, nan, %v480_v19 }
  0xa2   :  { %589 = vst [vmem:[#allocation5 + $0x18] sm:$0xff] %v481_v12  ;;  %v562_v21 = vand.u32 2147483647, %v561_v15 }
  0xa4   :  { %v565_v23 = vmul.f32 %v564_v14, %v562_v21 }
  0xa6   :  { %v566_v46 = vxor.u32 2147483648, %v565_v23 }
  0xa8   :  { %v567_v48 = vsel %vm484_vm11, %v566_v46, %v565_v23 }
  0xa9   :  { %v570_v28 = vsel %vm483_vm12, %v767_v18, %v567_v48 }
  0xaa   :  { %676 = vcosq.f32 %v570_v28 }
  0xab   :  { %678 = vsinq.f32 %v570_v28 }
  0xb7   :  { %v677_v29 = vpop.eup %676 }
  0xb8   :  { %v679_v16 = vpop.eup %678  ;;  %v582_v30 = vxor.u32 2147483648, %v677_v29 }
  0xb9   :  { %v579_v31 = vxor.u32 2147483648, %v679_v16 }
  0xba   :  { %v583_v20 = vsel %vm581_vm13, %v582_v30, %v679_v16 }
  0xbb   :  { %v580_v39 = vsel %vm578_vm14, %v677_v29, %v579_v31 }
  0xbc   :  { %v584_v47 = vsel %vm577_vm15, %v580_v39, %v583_v20 }
  0xbd   :  { %v585_v37 = vsel %vm574_vm0, nan, %v584_v47 }
  0xbe   :  { %590 = vst [vmem:[#allocation5 + $0x20] sm:$0xff] %v585_v37 }
  0xbf   :  { %711 = shalt.err (!%p708_p9)
}
  0xc0   :  { %s732_s18 = smov 128   ;;  %s733_s19 = smov 8  }
  0xc1   :  { %602 = dma.vmem_to_hbm [thread:$0]  %s597_s1, 640, %s1133_s2, [#allocation4], %s732_s18, %s732_s18, %s733_s19  }
  0xc2   :  { %722 = dma.done.wait [#allocation4], 640  }
  0xc3   :  { %723 = vsyncadd [#allocation4], 4294966656 }
  0xc4   :  { %606 = vsyncpa [#allocation3], 1 }
  0xc5   :  { %607 = vsyncpa [#allocation4], 1 }

</bundles_post_ra>
